<compile_context>
chip_gen: v5e
topology: v5e:2x2
jax: 0.10.0
libtpu: 0.0.40
codegen_flags: <defaults>
</compile_context>

<pallas_src>
import jax
import jax.numpy as jnp
from jax.experimental import pallas as pl
from jax.experimental.pallas import tpu as pltpu


def ppo_fused_kernel(x_ref, w1_ref, b1_ref, wh_ref, bh_ref, out_ref):
    # fc1 -> ReLU  (bias is a (1, H) broadcast add on the VPU)
    h = jnp.maximum(
        jnp.dot(x_ref[...], w1_ref[...], preferred_element_type=jnp.float32)
        + b1_ref[...],
        0.0,
    )
    # Fused actor|critic head, lane-padded to a dense 128-wide output so the
    # store is an unmasked vst.
    out_ref[...] = (
        jnp.dot(h, wh_ref[...], preferred_element_type=jnp.float32) + bh_ref[...]
    ).astype(out_ref.dtype)


def _round_up(n, m):
    return ((n + m - 1) // m) * m


def ppo_forward(x, w1, b1, wa, ba, wc, bc, *, batch_tile=128):
    """Forward pass of PPOModel.

    x:  [B, obs]
    w1: [obs, H], b1: [1, H]
    wa: [H, A],   ba: [1, A]
    wc: [H, 1],   bc: [1, 1]
    Returns (logits [B, A], value [B]).
    """
    B, obs = x.shape
    H = w1.shape[1]
    A = wa.shape[1]
    OUT = A + 1                                   # logits | value
    OUT_PAD = 128 * pl.cdiv(OUT, 128)             # lane-dense output width

    f32 = jnp.float32

    # ---- fuse actor|critic heads, lane-pad to 128 ----------------------------
    w_head = jnp.concatenate([wa, wc.reshape(H, 1)], axis=1)             # [H, A+1]
    b_head = jnp.concatenate([ba.reshape(1, A), bc.reshape(1, 1)], 1)    # [1, A+1]
    w_head = jnp.pad(w_head, ((0, 0), (0, OUT_PAD - OUT)))               # [H, 128]
    b_head = jnp.pad(b_head, ((0, 0), (0, OUT_PAD - OUT)))               # [1, 128]

    # ---- batch tiling (pad only when the tile does not divide B) -------------
    TB = batch_tile if B >= batch_tile else _round_up(B, 8)
    B_pad = _round_up(B, TB)
    x_in = x.astype(f32)
    if B_pad != B:
        x_in = jnp.pad(x_in, ((0, B_pad - B), (0, 0)))

    grid = (B_pad // TB,)

    flops = 2 * B_pad * (obs * H + H * OUT_PAD)
    bytes_accessed = 4 * (
        B_pad * obs + obs * H + H + H * OUT_PAD + OUT_PAD + B_pad * OUT_PAD
    )

    out = pl.pallas_call(
        ppo_fused_kernel,
        out_shape=jax.ShapeDtypeStruct((B_pad, OUT_PAD), f32),
        grid_spec=pltpu.PrefetchScalarGridSpec(
            num_scalar_prefetch=0,
            grid=grid,
            in_specs=[
                pl.BlockSpec((TB, obs), lambda i: (i, 0)),       # x tile
                pl.BlockSpec((obs, H), lambda i: (0, 0)),        # fc1 W (resident)
                pl.BlockSpec((1, H), lambda i: (0, 0)),          # fc1 b (resident)
                pl.BlockSpec((H, OUT_PAD), lambda i: (0, 0)),    # head W (resident)
                pl.BlockSpec((1, OUT_PAD), lambda i: (0, 0)),    # head b (resident)
            ],
            out_specs=pl.BlockSpec((TB, OUT_PAD), lambda i: (i, 0)),
        ),
        compiler_params=pltpu.CompilerParams(
            dimension_semantics=("parallel",),
        ),
        cost_estimate=pl.CostEstimate(
            flops=flops, transcendentals=0, bytes_accessed=bytes_accessed
        ),
    )(x_in, w1.astype(f32), b1.astype(f32), w_head, b_head)

    logits = out[:B, :A]
    value = out[:B, A]
    return logits, value


def init_params(key, obs_size, action_size, hidden_size):
    """Deterministic init mimicking nn.Linear's U(-1/sqrt(fan_in), 1/sqrt(fan_in))."""
    ks = jax.random.split(key, 6)

    def uniform(k, shape, fan_in):
        bound = 1.0 / jnp.sqrt(jnp.float32(fan_in))
        return jax.random.uniform(k, shape, jnp.float32, -bound, bound)

    w1 = uniform(ks[0], (obs_size, hidden_size), obs_size)
    b1 = uniform(ks[1], (1, hidden_size), obs_size)
    wa = uniform(ks[2], (hidden_size, action_size), hidden_size)
    ba = uniform(ks[3], (1, action_size), hidden_size)
    wc = uniform(ks[4], (hidden_size, 1), hidden_size)
    bc = uniform(ks[5], (1, 1), hidden_size)
    return w1, b1, wa, ba, wc, bc


def _reference(x, w1, b1, wa, ba, wc, bc):
    h = jnp.maximum(x @ w1 + b1, 0.0)
    return h @ wa + ba, (h @ wc + bc).squeeze(-1)


if __name__ == "__main__":
    obs_size, action_size, hidden_size = 32, 8, 64

    key = jax.random.PRNGKey(0)
    k_x, k_x2, k_p = jax.random.split(key, 3)
    params = init_params(k_p, obs_size, action_size, hidden_size)

    # ---- case 1: single-tile batch, no padding / no x copy -------------------
    batch = 8
    x = jax.random.normal(k_x, (batch, obs_size), jnp.float32)
    logits, value = jax.block_until_ready(ppo_forward(x, *params))
    logits_ref, value_ref = _reference(x, *params)
    assert logits.shape == (batch, action_size)
    assert value.shape == (batch,)
    assert jnp.allclose(logits, logits_ref, atol=1e-5)
    assert jnp.allclose(value, value_ref, atol=1e-5)

    # ---- case 2: multi-step batch grid with padding (exercises the pipeline) -
    batch2 = 20
    x2 = jax.random.normal(k_x2, (batch2, obs_size), jnp.float32)
    logits2, value2 = jax.block_until_ready(
        ppo_forward(x2, *params, batch_tile=8)
    )
    logits2_ref, value2_ref = _reference(x2, *params)
    assert logits2.shape == (batch2, action_size)
    assert value2.shape == (batch2,)
    assert jnp.allclose(logits2, logits2_ref, atol=1e-5)
    assert jnp.allclose(value2, value2_ref, atol=1e-5)

    print("KERNEL_OK")
</pallas_src>

<mosaic_0001>
module attributes {stable_mosaic.version = 11 : i64} {
  func.func @ppo_fused_kernel(%arg0: i32, %arg1: memref<8x32xf32, #tpu.memory_space<vmem>>, %arg2: memref<32x64xf32, #tpu.memory_space<vmem>>, %arg3: memref<1x64xf32, #tpu.memory_space<vmem>>, %arg4: memref<64x128xf32, #tpu.memory_space<vmem>>, %arg5: memref<1x128xf32, #tpu.memory_space<vmem>>, %arg6: memref<8x128xf32, #tpu.memory_space<vmem>>) attributes {dimension_semantics = [#tpu.dimension_semantics<parallel>], iteration_bounds = array<i64: 1>, scalar_prefetch = 0 : i64, scratch_operands = 0 : i64, tpu.core_type = #tpu.core_type<tc>, window_params = [{transform_indices = @transform_0, window_bounds = array<i64: 8, 32>}, {pipeline_mode = #tpu.pipeline_mode<synchronous>, transform_indices = @transform_1, window_bounds = array<i64: 32, 64>}, {pipeline_mode = #tpu.pipeline_mode<synchronous>, transform_indices = @transform_2, window_bounds = array<i64: 1, 64>}, {pipeline_mode = #tpu.pipeline_mode<synchronous>, transform_indices = @transform_3, window_bounds = array<i64: 64, 128>}, {pipeline_mode = #tpu.pipeline_mode<synchronous>, transform_indices = @transform_4, window_bounds = array<i64: 1, 128>}, {transform_indices = @transform_5, window_bounds = array<i64: 8, 128>}]} {
    %c0 = arith.constant 0 : index
    %c0_0 = arith.constant 0 : index
    %0 = vector.load %arg1[%c0, %c0_0] : memref<8x32xf32, #tpu.memory_space<vmem>>, vector<8x32xf32>
    %c0_1 = arith.constant 0 : index
    %c0_2 = arith.constant 0 : index
    %1 = vector.load %arg2[%c0_1, %c0_2] : memref<32x64xf32, #tpu.memory_space<vmem>>, vector<32x64xf32>
    %cst = arith.constant dense<0.000000e+00> : vector<8x64xf32>
    %2 = tpu.matmul %0, %1, %cst {dimension_numbers = #tpu.dot_dimension_numbers<[1], [0], [0], [1], [0, 0, 1, 1], [], []>} : vector<8x32xf32>, vector<32x64xf32>, vector<8x64xf32> -> vector<8x64xf32>
    %c0_3 = arith.constant 0 : index
    %c0_4 = arith.constant 0 : index
    %3 = vector.load %arg3[%c0_3, %c0_4] : memref<1x64xf32, #tpu.memory_space<vmem>>, vector<1x64xf32>
    %4 = vector.broadcast %3 : vector<1x64xf32> to vector<8x64xf32>
    %5 = arith.addf %2, %4 : vector<8x64xf32>
    %cst_5 = arith.constant 0.000000e+00 : f32
    %6 = vector.broadcast %cst_5 : f32 to vector<8x64xf32>
    %7 = arith.maximumf %5, %6 : vector<8x64xf32>
    %c0_6 = arith.constant 0 : index
    %c0_7 = arith.constant 0 : index
    %8 = vector.load %arg4[%c0_6, %c0_7] : memref<64x128xf32, #tpu.memory_space<vmem>>, vector<64x128xf32>
    %cst_8 = arith.constant dense<0.000000e+00> : vector<8x128xf32>
    %9 = tpu.matmul %7, %8, %cst_8 {dimension_numbers = #tpu.dot_dimension_numbers<[1], [0], [0], [1], [0, 0, 1, 1], [], []>} : vector<8x64xf32>, vector<64x128xf32>, vector<8x128xf32> -> vector<8x128xf32>
    %c0_9 = arith.constant 0 : index
    %c0_10 = arith.constant 0 : index
    %10 = vector.load %arg5[%c0_9, %c0_10] : memref<1x128xf32, #tpu.memory_space<vmem>>, vector<1x128xf32>
    %11 = vector.broadcast %10 : vector<1x128xf32> to vector<8x128xf32>
    %12 = arith.addf %9, %11 : vector<8x128xf32>
    %c0_11 = arith.constant 0 : index
    %c0_12 = arith.constant 0 : index
    %13 = vector.load %arg6[%c0_11, %c0_12] : memref<8x128xf32, #tpu.memory_space<vmem>>, vector<8x128xf32>
    tpu.vector_store %arg6[%c0_11, %c0_12], %12 {strides = array<i32>} : memref<8x128xf32, #tpu.memory_space<vmem>>, vector<8x128xf32>,
    return
  }
  func.func @transform_0(%arg0: i32) -> (i32, i32) {
    %c0_i32 = arith.constant 0 : i32
    %c0_i32_0 = arith.constant 0 : i32
    return %arg0, %c0_i32 : i32, i32
  }
  func.func @transform_1(%arg0: i32) -> (i32, i32) {
    %c0_i32 = arith.constant 0 : i32
    %c0_i32_0 = arith.constant 0 : i32
    %c0_i32_1 = arith.constant 0 : i32
    return %c0_i32, %c0_i32_0 : i32, i32
  }
  func.func @transform_2(%arg0: i32) -> (i32, i32) {
    %c0_i32 = arith.constant 0 : i32
    %c0_i32_0 = arith.constant 0 : i32
    %c0_i32_1 = arith.constant 0 : i32
    return %c0_i32, %c0_i32_0 : i32, i32
  }
  func.func @transform_3(%arg0: i32) -> (i32, i32) {
    %c0_i32 = arith.constant 0 : i32
    %c0_i32_0 = arith.constant 0 : i32
    %c0_i32_1 = arith.constant 0 : i32
    return %c0_i32, %c0_i32_0 : i32, i32
  }
  func.func @transform_4(%arg0: i32) -> (i32, i32) {
    %c0_i32 = arith.constant 0 : i32
    %c0_i32_0 = arith.constant 0 : i32
    %c0_i32_1 = arith.constant 0 : i32
    return %c0_i32, %c0_i32_0 : i32, i32
  }
  func.func @transform_5(%arg0: i32) -> (i32, i32) {
    %c0_i32 = arith.constant 0 : i32
    %c0_i32_0 = arith.constant 0 : i32
    return %arg0, %c0_i32 : i32, i32
  }
}

</mosaic_0001>

<bundles_post_ra>
// kernel: tpu_custom_call.1
= control target key start
LH: loop header
LB: loop body
LE: loop exit
PB: predicated region body
PF: predicated region fallthrough
CT: control target
= control target key end

     0   :  { %10 = vsyncpa [#allocation3], 0  ;;  %s321_s0 = inlined_call_operand.hbm [shape: f32[8,32], index: 0, kind: input, shape index: {}]   ;;  %s322_s1 = inlined_call_operand.hbm [shape: f32[32,64], index: 1, kind: input, shape index: {}]   ;;  %s323_s2 = inlined_call_operand.vmem [shape: f32[1,64], index: 2, kind: input, shape index: {}]   ;;  %s324_s3 = inlined_call_operand.hbm [shape: f32[64,128], index: 3, kind: input, shape index: {}]   ;;  %s325_s4 = inlined_call_operand.vmem [shape: f32[1,128], index: 4, kind: input, shape index: {}]   ;;  %s326_s5 = inlined_call_operand.hbm [shape: f32[8,128], index: 5, kind: output, shape index: {}]  }
   0x1   :  { %11 = vsyncpa [#allocation6], 0  ;;  %s28_s20 = sshll.u32 %s322_s1, 4  ;;  %s29_s20 = int_to_ptr.hbm [resolvable:$true] %s28_s20 }
   0x2   :  { %12 = vsyncpa [#allocation4], 0  ;;  %s267_s21 = smov [#allocation5]   ;;  %s18_s25 = sshll.u32 %s321_s0, 4  ;;  %s19_s25 = int_to_ptr.hbm [resolvable:$true] %s18_s25 }
   0x3   :  { %s30_s22 = sshll.u32 %s267_s21, 4  ;;  %s268_s26 = smov 128   ;;  %s31_s22 = int_to_ptr.vmem [resolvable:$true] %s30_s22 }
   0x4   :  { %s269_s27 = smov 8   ;;  %s270_s28 = smov [#allocation2]  }
   0x5   :  { %36 = dma.hbm_to_vmem [thread:$0]  %s29_s20, 512, %s31_s22, [#allocation6], %s268_s26, %s268_s26, %s269_s27  }
   0x6   :  { %s20_s29 = sshll.u32 %s270_s28, 4  ;;  %s43_s7 = sshll.u32 %s324_s3, 4  ;;  %s21_s29 = int_to_ptr.vmem [resolvable:$true] %s20_s29  ;;  %s44_s7 = int_to_ptr.hbm [resolvable:$true] %s43_s7 }
   0x7   :  { %23 = dma.hbm_to_vmem [thread:$0]  %s19_s25, 128, %s21_s29, [#allocation3]  }
   0x8   :  { %s271_s1 = smov [#allocation7]  }
   0x9   :  { %s45_s8 = sshll.u32 %s271_s1, 4  ;;  %s46_s8 = int_to_ptr.vmem [resolvable:$true] %s45_s8 }
   0xa   :  { %51 = dma.hbm_to_vmem [thread:$0]  %s44_s7, 1024, %s46_s8, [#allocation6], %s268_s26, %s268_s26, %s269_s27  }
   0xb   :  { %261 = dma.done.wait [#allocation3], 128  }
   0xc   :  { %262 = vsyncadd [#allocation3], 4294967168 }
   0xd   :  { %263 = dma.done.wait [#allocation6], 1536  }
   0xe   :  { %264 = vsyncadd [#allocation6], 4294965760  ;;  %v70_v0 = vld [vmem:[#allocation5 + $0x18] sm:$0xff]  ;;  %v69_v1 = vld [vmem:[#allocation5 + $0x10] sm:$0xff]  ;;  %vm75_vm0 = vcmask 261120   ;;  %vm112_vm1 = vcmask 523264  }
   0xf   :  { %91 = vmatpush.msra.mxu0 %v70_v0  ;;  %v107_v2 = vld [vmem:[#allocation7 + $0x38] sm:$0xff]  ;;  %v68_v3 = vld [vmem:[#allocation5 + $0x8] sm:$0xff]  ;;  %v106_v4 = vld [vmem:[#allocation7 + $0x30] sm:$0xff]  ;;  %s272_s11 = smov [#allocation8]   ;;  %s144_s15 = sshll.u32 %s326_s5, 4  ;;  %s145_s15 = int_to_ptr.hbm [resolvable:$true] %s144_s15 }
  0x10   :  { %124 = vmatpush.msra.mxu1 %v107_v2  ;;  %v105_v5 = vld [vmem:[#allocation7 + $0x28] sm:$0xff]  ;;  %v67_v6 = vld [vmem:[#allocation5] sm:$0xff]  ;;  %v66_v7 = vld [vmem:[#allocation2] sm:$0xff]  ;;  %s142_s12 = sshll.u32 %s272_s11, 4  ;;  %s143_s12 = int_to_ptr.vmem [resolvable:$true] %s142_s12 }
  0x11   :  { %92 = vmatpush.msra.mxu0 %v69_v1  ;;  %v104_v8 = vld [vmem:[#allocation7 + $0x20] sm:$0xff]  ;;  %v103_v9 = vld [vmem:[#allocation7 + $0x18] sm:$0xff]  ;;  %v102_v10 = vld [vmem:[#allocation7 + $0x10] sm:$0xff] }
  0x12   :  { %125 = vmatpush.msra.mxu1 %v106_v4  ;;  %v101_v11 = vld [vmem:[#allocation7 + $0x8] sm:$0xff]  ;;  %v100_v12 = vld [vmem:[#allocation7] sm:$0xff]  ;;  %v163_v13 = vld [vmem:[%s323_s2] ss:$0 sm:$0xff] }
  0x13   :  { %93 = vmatpush.msra.mxu0 %v68_v3  ;;  %v164_v17 = vld [vmem:[%s325_s4] ss:$0 sm:$0xff] }
  0x14   :  { %126 = vmatpush.msra.mxu1 %v105_v5 }
  0x15   :  { %94 = vmatpush.msra.mxu0 %v67_v6 }
  0x16   :  { %155 = vmatmul.msk.f32.vlgmr.msra.gmra.mxu0 %vm75_vm0, %v66_v7  ;;  %127 = vmatpush.msra.mxu1 %v104_v8 }
  0x18   :  { %128 = vmatpush.msra.mxu1 %v103_v9 }
  0x1a   :  { %129 = vmatpush.msra.mxu1 %v102_v10 }
  0x1c   :  { %130 = vmatpush.msra.mxu1 %v101_v11 }
  0x1e   :  { %131 = vmatpush.msra.mxu1 %v100_v12 }
  0x93   :  { %v96_v14 = vpop.f32.mrf.mxu0 }
  0x94   :  { %v97_v15 = vadd.f32 %v163_v13, %v96_v14 }
  0x96   :  { %v99_v16 = vmax.f32 %v97_v15, 0.0 }
  0x98   :  { %156 = vmatmul.msk.f32.vlgmr.msra.gmra.mxu1 %vm112_vm1, %v99_v16 }
 0x115   :  { %v133_v18 = vpop.f32.mrf.mxu1 }
 0x116   :  { %v134_v19 = vadd.f32 %v164_v17, %v133_v18 }
 0x118   :  { %136 = vst [vmem:[#allocation8] sm:$0xff] %v134_v19 }
 0x119   :  { %147 = dma.vmem_to_hbm [thread:$0]  %s143_s12, 128, %s145_s15, [#allocation4]  }
 0x11a   :  { %265 = dma.done.wait [#allocation4], 128  }
 0x11b   :  { %266 = vsyncadd [#allocation4], 4294967168 }
 0x11c   :  { %152 = vsyncpa [#allocation3], 1 }
 0x11d   :  { %153 = vsyncpa [#allocation6], 1 }
 0x11e   :  { %154 = vsyncpa [#allocation4], 1 }

</bundles_post_ra>
